<compile_context>
chip_gen: v7x
topology: tpu7x:2x2x1
jax: 0.10.0
libtpu: 0.0.40
codegen_flags: <defaults>
</compile_context>

<pallas_src>
import numpy as np
import jax
import jax.numpy as jnp
from jax.experimental import pallas as pl
from jax.experimental.pallas import tpu as pltpu


def _round_up(x, m):
    return ((x + m - 1) // m) * m


def _fourier_dense_swish_kernel(t_ref, w_ref, lw_ref, lb_ref, o_ref):
    # t_ref : (TB, 1)   f32  time steps for this batch tile
    # w_ref : (1, H)    f32  frozen Fourier weights, pre-scaled by 2*pi
    # lw_ref: (2H, E)   bf16 Linear weight, stored as (in, out)
    # lb_ref: (1, E)    f32  Linear bias
    # o_ref : (TB, E)   f32  output embedding
    proj = t_ref[...] * w_ref[...]                        # (TB, H) VPU broadcast-mul

    # sin/cos (EUP) stay in vregs; with H = 128 each half is exactly one lane block,
    # so the concatenate is pure vreg placement (no cross-lane shuffle) and the MXU
    # consumes it directly -- no VMEM scratch round-trip.
    four = jnp.concatenate([jnp.sin(proj), jnp.cos(proj)],
                           axis=-1).astype(jnp.bfloat16)  # (TB, 2H)

    # Single K = 2H dot keeps the 256-wide MXU on v6e/v7x fully fed.
    # bf16 operands (explicit, intentional), f32 accumulation.
    z = jnp.dot(four, lw_ref[...], preferred_element_type=jnp.float32)
    z = z + lb_ref[...]

    # swish: z * sigmoid(z).  exp and the approximate reciprocal both go to the EUP
    # slot instead of spending VPU cycles on a refined f32 divide.
    o_ref[...] = z * pl.reciprocal(1.0 + jnp.exp(-z), approx=True)


def _choose_batch_tile(batch, block_b):
    """Pick a batch tile.

    The kernel is launch/overhead bound, so use as few grid steps as possible
    (working set at tb=1024 is only a few MiB, far below VMEM on any generation).
    If more than one tile is needed, keep an EVEN tile count so the "parallel"
    grid axis can be sharded across v7x's two TensorCores.
    """
    b8 = _round_up(batch, 8)
    if b8 <= block_b:
        return b8
    n_tiles = _round_up(pl.cdiv(b8, block_b), 2)
    return _round_up(pl.cdiv(b8, n_tiles), 8)


def fourier_dense_embed(t, w_2pi, lin_w, lin_b, *, block_b=1024):
    """swish(concat([sin(t*w_2pi), cos(t*w_2pi)]) @ lin_w + lin_b) -> (B, E) f32.

    t: (B,) f32; w_2pi: (H,) f32 (= Fourier W * 2*pi, folded at parameter-init time);
    lin_w: (2H, E); lin_b: (E,).
    """
    B = t.shape[0]
    H = w_2pi.shape[0]
    E = lin_w.shape[1]
    assert lin_w.shape[0] == 2 * H and lin_b.shape == (E,)
    assert H % 128 == 0 and E % 128 == 0, "lane-dense layout assumed (embed_dim mult of 256)"

    tb = _choose_batch_tile(B, block_b)
    grid = (pl.cdiv(B, tb),)   # ragged last tile handled by pipeline masking; no pad/slice

    t2d = t.astype(jnp.float32).reshape(B, 1)
    w2d = w_2pi.reshape(1, H).astype(jnp.float32)
    lw = lin_w.astype(jnp.bfloat16)            # MXU-native operand; halves weight DMA
    lb2d = lin_b.reshape(1, E).astype(jnp.float32)

    return pl.pallas_call(
        _fourier_dense_swish_kernel,
        out_shape=jax.ShapeDtypeStruct((B, E), jnp.float32),
        grid_spec=pltpu.PrefetchScalarGridSpec(
            num_scalar_prefetch=0,
            grid=grid,
            in_specs=[
                pl.BlockSpec((tb, 1), lambda i: (i, 0)),      # t tile
                pl.BlockSpec((1, H), lambda i: (0, 0)),       # Fourier weights (resident)
                pl.BlockSpec((2 * H, E), lambda i: (0, 0)),   # Linear weight (resident)
                pl.BlockSpec((1, E), lambda i: (0, 0)),       # Linear bias (resident)
            ],
            out_specs=pl.BlockSpec((tb, E), lambda i: (i, 0)),
        ),
        compiler_params=pltpu.CompilerParams(
            # Batch tiles are independent -> shard across both TensorCores on v7x.
            dimension_semantics=("parallel",),
        ),
    )(t2d, w2d, lw, lb2d)


def reference(t, W, lin_w, lin_b):
    """Float64 numpy reference matching the PyTorch module semantics:
    act(Linear(GaussianFourierProjection(t)))."""
    t = np.asarray(t, np.float64)
    W = np.asarray(W, np.float64)
    proj = t[:, None] * W[None, :] * 2.0 * np.pi
    four = np.concatenate([np.sin(proj), np.cos(proj)], axis=-1)
    z = four @ np.asarray(lin_w, np.float64) + np.asarray(lin_b, np.float64)[None, :]
    return z / (1.0 + np.exp(-z))


if __name__ == "__main__":
    key = jax.random.PRNGKey(0)
    k_w, k_lw, k_lb, k_t = jax.random.split(key, 4)

    embed_dim = 256          # ScoreNet default -> output is two lane-dense 128 blocks
    scale = 30.0
    batch = 8                # small smoke-test batch

    H = embed_dim // 2
    # Frozen, non-trainable GFP weights (torch.randn(embed_dim//2) * scale).
    W = jax.random.normal(k_w, (H,), dtype=jnp.float32) * scale
    # Fold the 2*pi factor in once at parameter-init time (W never changes).
    W_2pi = W * (2.0 * np.pi)
    # nn.Linear(embed_dim, embed_dim) parameters, stored as (in, out).
    lin_w = jax.random.normal(k_lw, (embed_dim, embed_dim), dtype=jnp.float32) / np.sqrt(embed_dim)
    lin_b = jax.random.normal(k_lb, (embed_dim,), dtype=jnp.float32) * 0.01
    # Time steps.
    t = jax.random.uniform(k_t, (batch,), dtype=jnp.float32)

    out = jax.block_until_ready(fourier_dense_embed(t, W_2pi, lin_w, lin_b))
    assert out.shape == (batch, embed_dim), out.shape

    ref = reference(np.asarray(t), np.asarray(W), np.asarray(lin_w), np.asarray(lin_b))
    # The kernel intentionally feeds the MXU bf16 operands (the default MXU precision
    # truncates f32 operands to bf16 anyway; the explicit cast just halves the weight
    # DMA). Against a float64 reference this bounds the error at roughly
    # sqrt(K) * 2^-9 * O(1) ~ 5e-3 typical for K = 256, with a small tail margin.
    np.testing.assert_allclose(np.asarray(out), ref, rtol=2e-2, atol=2e-2)

    print("KERNEL_OK")
</pallas_src>

<mosaic_0001>
module attributes {stable_mosaic.version = 11 : i64} {
  func.func @_fourier_dense_swish_kernel(%arg0: i32, %arg1: memref<8x1xf32, #tpu.memory_space<vmem>>, %arg2: memref<1x128xf32, #tpu.memory_space<vmem>>, %arg3: memref<256x256xbf16, #tpu.memory_space<vmem>>, %arg4: memref<1x256xf32, #tpu.memory_space<vmem>>, %arg5: memref<8x256xf32, #tpu.memory_space<vmem>>) attributes {dimension_semantics = [#tpu.dimension_semantics<parallel>], iteration_bounds = array<i64: 1>, scalar_prefetch = 0 : i64, scratch_operands = 0 : i64, tpu.core_type = #tpu.core_type<tc>, window_params = [{transform_indices = @transform_0, window_bounds = array<i64: 8, 1>}, {pipeline_mode = #tpu.pipeline_mode<synchronous>, transform_indices = @transform_1, window_bounds = array<i64: 1, 128>}, {pipeline_mode = #tpu.pipeline_mode<synchronous>, transform_indices = @transform_2, window_bounds = array<i64: 256, 256>}, {pipeline_mode = #tpu.pipeline_mode<synchronous>, transform_indices = @transform_3, window_bounds = array<i64: 1, 256>}, {transform_indices = @transform_4, window_bounds = array<i64: 8, 256>}]} {
    %c0 = arith.constant 0 : index
    %c0_0 = arith.constant 0 : index
    %0 = vector.load %arg1[%c0, %c0_0] : memref<8x1xf32, #tpu.memory_space<vmem>>, vector<8x1xf32>
    %c0_1 = arith.constant 0 : index
    %c0_2 = arith.constant 0 : index
    %1 = vector.load %arg2[%c0_1, %c0_2] : memref<1x128xf32, #tpu.memory_space<vmem>>, vector<1x128xf32>
    %2 = vector.broadcast %0 : vector<8x1xf32> to vector<8x128xf32>
    %3 = vector.broadcast %1 : vector<1x128xf32> to vector<8x128xf32>
    %4 = arith.mulf %2, %3 : vector<8x128xf32>
    %5 = math.sin %4 : vector<8x128xf32>
    %6 = math.cos %4 : vector<8x128xf32>
    %7 = tpu.concatenate %5, %6 in 1 : vector<8x128xf32>, vector<8x128xf32> -> vector<8x256xf32>
    %8 = arith.truncf %7 : vector<8x256xf32> to vector<8x256xbf16>
    %c0_3 = arith.constant 0 : index
    %c0_4 = arith.constant 0 : index
    %9 = vector.load %arg3[%c0_3, %c0_4] : memref<256x256xbf16, #tpu.memory_space<vmem>>, vector<256x256xbf16>
    %cst = arith.constant dense<0.000000e+00> : vector<8x256xf32>
    %10 = tpu.matmul %8, %9, %cst {dimension_numbers = #tpu.dot_dimension_numbers<[1], [0], [0], [1], [0, 0, 1, 1], [], []>} : vector<8x256xbf16>, vector<256x256xbf16>, vector<8x256xf32> -> vector<8x256xf32>
    %c0_5 = arith.constant 0 : index
    %c0_6 = arith.constant 0 : index
    %11 = vector.load %arg4[%c0_5, %c0_6] : memref<1x256xf32, #tpu.memory_space<vmem>>, vector<1x256xf32>
    %12 = vector.broadcast %11 : vector<1x256xf32> to vector<8x256xf32>
    %13 = arith.addf %10, %12 : vector<8x256xf32>
    %cst_7 = arith.constant 0.000000e+00 : f32
    %14 = vector.broadcast %cst_7 : f32 to vector<8x256xf32>
    %15 = arith.subf %14, %13 : vector<8x256xf32>
    %16 = math.exp %15 : vector<8x256xf32>
    %cst_8 = arith.constant 1.000000e+00 : f32
    %17 = vector.broadcast %cst_8 : f32 to vector<8x256xf32>
    %18 = arith.addf %17, %16 : vector<8x256xf32>
    %19 = tpu.reciprocal %18 {approx = true} : vector<8x256xf32> -> vector<8x256xf32>
    %20 = arith.mulf %13, %19 : vector<8x256xf32>
    %c0_9 = arith.constant 0 : index
    %c0_10 = arith.constant 0 : index
    %21 = vector.load %arg5[%c0_9, %c0_10] : memref<8x256xf32, #tpu.memory_space<vmem>>, vector<8x256xf32>
    tpu.vector_store %arg5[%c0_9, %c0_10], %20 {strides = array<i32>} : memref<8x256xf32, #tpu.memory_space<vmem>>, vector<8x256xf32>,
    return
  }
  func.func @transform_0(%arg0: i32) -> (i32, i32) {
    %c0_i32 = arith.constant 0 : i32
    %c0_i32_0 = arith.constant 0 : i32
    return %arg0, %c0_i32 : i32, i32
  }
  func.func @transform_1(%arg0: i32) -> (i32, i32) {
    %c0_i32 = arith.constant 0 : i32
    %c0_i32_0 = arith.constant 0 : i32
    %c0_i32_1 = arith.constant 0 : i32
    return %c0_i32, %c0_i32_0 : i32, i32
  }
  func.func @transform_2(%arg0: i32) -> (i32, i32) {
    %c0_i32 = arith.constant 0 : i32
    %c0_i32_0 = arith.constant 0 : i32
    %c0_i32_1 = arith.constant 0 : i32
    return %c0_i32, %c0_i32_0 : i32, i32
  }
  func.func @transform_3(%arg0: i32) -> (i32, i32) {
    %c0_i32 = arith.constant 0 : i32
    %c0_i32_0 = arith.constant 0 : i32
    %c0_i32_1 = arith.constant 0 : i32
    return %c0_i32, %c0_i32_0 : i32, i32
  }
  func.func @transform_4(%arg0: i32) -> (i32, i32) {
    %c0_i32 = arith.constant 0 : i32
    %c0_i32_0 = arith.constant 0 : i32
    return %arg0, %c0_i32 : i32, i32
  }
}

</mosaic_0001>

<bundles_post_ra>
// kernel: tpu_custom_call.1
= control target key start
LH: loop header
LB: loop body
LE: loop exit
PB: predicated region body
PF: predicated region fallthrough
CT: control target
= control target key end

     0   :  { %9 = vsyncpa [#allocation3], 0  ;;  %s784_s0 = inlined_call_operand.vmem [shape: f32[8,1], index: 0, kind: input, shape index: {}]   ;;  %s785_s1 = inlined_call_operand.vmem [shape: f32[1,128], index: 1, kind: input, shape index: {}]   ;;  %s786_s2 = inlined_call_operand.hbm [shape: bf16[256,256], index: 2, kind: input, shape index: {}]   ;;  %s787_s3 = inlined_call_operand.vmem [shape: f32[1,256], index: 3, kind: input, shape index: {}]   ;;  %s788_s4 = inlined_call_operand.hbm [shape: f32[8,256], index: 4, kind: output, shape index: {}]  }
   0x1   :  { %10 = vsyncpa [#allocation4], 0  ;;  %s694_s15 = smov [#allocation2]   ;;  %s646_s19 = scalar_lea.hbm %s786_s2, 4096 }
   0x2   :  { %s20_s16 = sshll.u32 %s694_s15, 4  ;;  %p647_p0 = scmp.ne.s32.totalorder %s786_s2, %s646_s19  ;;  %s21_s16 = int_to_ptr.vmem [resolvable:$true] %s20_s16 }
   0x3   :  { %p650_p1 = scmp.lt.u32.totalorder %s646_s19, %s786_s2 }
   0x5   :  { %p652_p2 = pnand %p650_p1, %p647_p0 }
   0x7   :  { %655 = shalt.err (!%p652_p2)
}
   0x8   :  { %s656_s24 = scalar_lea.vmem %s21_s16, 4096  ;;  %p661_p4 = scmp.lt.s32.totalorder %s21_s16, %s21_s16 }
   0x9   :  { %p657_p3 = scmp.ne.s32.totalorder %s21_s16, %s656_s24  ;;  %p662_p5 = scmp.lt.s32.totalorder %s656_s24, %s656_s24 }
   0xb   :  { %p663_p6 = por %p662_p5, %p661_p4 }
   0xd   :  { %p664_p7 = pnand %p663_p6, %p657_p3 }
   0xf   :  { %667 = shalt.err (!%p664_p7)
}
  0x10   :  { %s695_s25 = smov 128   ;;  %s696_s26 = smov 8  }
  0x11   :  { %26 = dma.hbm_to_vmem [thread:$0]  %s786_s2, 4096, %s21_s16, [#allocation3], %s695_s25, %s695_s25, %s696_s26  }
  0x12   :  { %690 = dma.done.wait [#allocation3], 4096  }
  0x13   :  { %691 = vsyncadd [#allocation3], 4294963200  ;;  %v697_v0 = vmov 0   ;;  %v32_v1 = vld [vmem:[%s784_s0] sm:$0xff]  ;;  %v589_v4 = vld [vmem:[#allocation2 + $0x14] ss:$8 sps:$4 sm:$0xff]  }
  0x14   :  { %585 = vset.pattern.permute.xlu0 %v697_v0  ;;  %v586_v2 = vld [vmem:[#allocation2 + $0x4] ss:$8 sps:$4 sm:$0xff]   ;;  %v588_v3 = vld [vmem:[#allocation2] ss:$8 sps:$4 sm:$0xff]   ;;  %v591_v5 = vld [vmem:[#allocation2 + $0x10] ss:$8 sps:$4 sm:$0xff]  }
  0x15   :  { %36 = vperm.xlu0 %585, %v32_v1   ;;  %459 = vmatprep.subr.bf16.mxu0 %v586_v2  ;;  %v592_v6 = vld [vmem:[#allocation2 + $0x24] ss:$8 sps:$4 sm:$0xff]   ;;  %v594_v7 = vld [vmem:[#allocation2 + $0x20] ss:$8 sps:$4 sm:$0xff]   ;;  %v595_v8 = vld [vmem:[#allocation2 + $0x34] ss:$8 sps:$4 sm:$0xff]  }
  0x16   :  { %460 = vmatpush1.bf16.msra.mxu0 %v588_v3  ;;  %v597_v9 = vld [vmem:[#allocation2 + $0x30] ss:$8 sps:$4 sm:$0xff]   ;;  %v598_v10 = vld [vmem:[#allocation2 + $0x44] ss:$8 sps:$4 sm:$0xff]   ;;  %v600_v11 = vld [vmem:[#allocation2 + $0x40] ss:$8 sps:$4 sm:$0xff]  }
  0x17   :  { %461 = vmatprep.subr.bf16.mxu0 %v589_v4  ;;  %v601_v12 = vld [vmem:[#allocation2 + $0x54] ss:$8 sps:$4 sm:$0xff]   ;;  %v603_v13 = vld [vmem:[#allocation2 + $0x50] ss:$8 sps:$4 sm:$0xff]   ;;  %v604_v14 = vld [vmem:[#allocation2 + $0x64] ss:$8 sps:$4 sm:$0xff]  }
  0x18   :  { %v606_v15 = vld [vmem:[#allocation2 + $0x60] ss:$8 sps:$4 sm:$0xff]   ;;  %v607_v16 = vld [vmem:[#allocation2 + $0x74] ss:$8 sps:$4 sm:$0xff]   ;;  %v609_v17 = vld [vmem:[#allocation2 + $0x70] ss:$8 sps:$4 sm:$0xff]  }
  0x19   :  { %v610_v18 = vld [vmem:[#allocation2 + $0x84] ss:$8 sps:$4 sm:$0xff]   ;;  %v612_v19 = vld [vmem:[#allocation2 + $0x80] ss:$8 sps:$4 sm:$0xff]   ;;  %v613_v20 = vld [vmem:[#allocation2 + $0x94] ss:$8 sps:$4 sm:$0xff]  }
  0x1a   :  { %462 = vmatpush1.bf16.msra.mxu0 %v591_v5  ;;  %v615_v21 = vld [vmem:[#allocation2 + $0x90] ss:$8 sps:$4 sm:$0xff]   ;;  %v616_v22 = vld [vmem:[#allocation2 + $0xa4] ss:$8 sps:$4 sm:$0xff]   ;;  %v618_v23 = vld [vmem:[#allocation2 + $0xa0] ss:$8 sps:$4 sm:$0xff]  }
  0x1b   :  { %463 = vmatprep.subr.bf16.mxu0 %v592_v6  ;;  %v619_v24 = vld [vmem:[#allocation2 + $0xb4] ss:$8 sps:$4 sm:$0xff]   ;;  %v621_v25 = vld [vmem:[#allocation2 + $0xb0] ss:$8 sps:$4 sm:$0xff]   ;;  %v622_v26 = vld [vmem:[#allocation2 + $0xc4] ss:$8 sps:$4 sm:$0xff]  }
  0x1c   :  { %v624_v27 = vld [vmem:[#allocation2 + $0xc0] ss:$8 sps:$4 sm:$0xff]   ;;  %v625_v28 = vld [vmem:[#allocation2 + $0xd4] ss:$8 sps:$4 sm:$0xff]   ;;  %v627_v29 = vld [vmem:[#allocation2 + $0xd0] ss:$8 sps:$4 sm:$0xff]  }
  0x1d   :  { %v628_v30 = vld [vmem:[#allocation2 + $0xe4] ss:$8 sps:$4 sm:$0xff]   ;;  %v630_v31 = vld [vmem:[#allocation2 + $0xe0] ss:$8 sps:$4 sm:$0xff]   ;;  %v631_v32 = vld [vmem:[#allocation2 + $0xf4] ss:$8 sps:$4 sm:$0xff]  }
  0x1e   :  { %464 = vmatpush1.bf16.msra.mxu0 %v594_v7  ;;  %v633_v33 = vld [vmem:[#allocation2 + $0xf0] ss:$8 sps:$4 sm:$0xff]   ;;  %v529_v34 = vld [vmem:[%s785_s1] ss:$0 sm:$0xff]  ;;  %v698_v48 = vmov 2102212464  }
  0x1f   :  { %465 = vmatprep.subr.bf16.mxu0 %v595_v8  ;;  %v699_v50 = vmov 920167782   ;;  %v700_v54 = vmov 1326507024   ;;  %v701_v56 = vmov 683565275  }
  0x20   :  { %v702_v58 = vmov 2475754826   ;;  %v703_v61 = vmov 2131351028  }
  0x22   :  { %466 = vmatpush1.bf16.msra.mxu0 %v597_v9 }
  0x23   :  { %467 = vmatprep.subr.bf16.mxu0 %v598_v10 }
  0x26   :  { %468 = vmatpush1.bf16.msra.mxu0 %v600_v11 }
  0x27   :  { %469 = vmatprep.subr.bf16.mxu0 %v601_v12 }
  0x2a   :  { %470 = vmatpush1.bf16.msra.mxu0 %v603_v13 }
  0x2b   :  { %471 = vmatprep.subr.bf16.mxu0 %v604_v14 }
  0x2e   :  { %472 = vmatpush1.bf16.msra.mxu0 %v606_v15 }
  0x2f   :  { %473 = vmatprep.subr.bf16.mxu0 %v607_v16 }
  0x32   :  { %474 = vmatpush1.bf16.msra.mxu0 %v609_v17 }
  0x33   :  { %475 = vmatprep.subr.bf16.mxu0 %v610_v18 }
  0x36   :  { %476 = vmatpush1.bf16.msra.mxu0 %v612_v19 }
  0x37   :  { %477 = vmatprep.subr.bf16.mxu0 %v613_v20 }
  0x3a   :  { %478 = vmatpush1.bf16.msra.mxu0 %v615_v21 }
  0x3b   :  { %479 = vmatprep.subr.bf16.mxu0 %v616_v22 }
  0x3e   :  { %480 = vmatpush1.bf16.msra.mxu0 %v618_v23 }
  0x3f   :  { %481 = vmatprep.subr.bf16.mxu0 %v619_v24 }
  0x42   :  { %482 = vmatpush1.bf16.msra.mxu0 %v621_v25 }
  0x43   :  { %483 = vmatprep.subr.bf16.mxu0 %v622_v26 }
  0x46   :  { %484 = vmatpush1.bf16.msra.mxu0 %v624_v27 }
  0x47   :  { %485 = vmatprep.subr.bf16.mxu0 %v625_v28 }
  0x4a   :  { %486 = vmatpush1.bf16.msra.mxu0 %v627_v29 }
  0x4b   :  { %487 = vmatprep.subr.bf16.mxu0 %v628_v30 }
  0x4e   :  { %488 = vmatpush1.bf16.msra.mxu0 %v630_v31 }
  0x4f   :  { %489 = vmatprep.subr.bf16.mxu0 %v631_v32 }
  0x52   :  { %490 = vmatpush1.bf16.msra.mxu0 %v633_v33 }
  0x94   :  { %v37_v35 = vpop.permute.xlu0 %36 }
  0x95   :  { %v748_v36 = vmul.f32 %v529_v34, %v37_v35 }
  0x97   :  { %v49_v37 = vand.u32 2139095040, %v748_v36  ;;  %v46_v38 = vand.u32 2147483647, %v748_v36  ;;  %vm48_vm7 = vcmp.lt.s32.totalorder %v748_v36, 0  ;;  %vm138_vm15 = vweird.f32 %v748_v36 }
  0x99   :  { %v50_v39 = vshrl.u32 %v49_v37, 23  ;;  %v53_v41 = vand.u32 8388607, %v46_v38  ;;  %vm47_vm8 = vcmp.le.f32.partialorder %v46_v38, 0.7853982 }
  0x9b   :  { %v530_v40 = vadd.s32 4294967169, %v50_v39  ;;  %v54_v44 = vor.u32 8388608, %v53_v41 }
  0x9d   :  { %v56_v42 = vadd.s32 1, %v530_v40  ;;  %v94_v52 = vshll.u32 %v54_v44, 8 }
  0x9f   :  { %vm57_vm0 = vcmp.gt.s32.totalorder %v56_v42, 0 }
  0xa0   :  { %v58_v43 = vsel %vm57_vm0, %v56_v42, 0 }
  0xa1   :  { %v60_v45 = vand.u32 31, %v58_v43  ;;  %v59_v46 = vshrl.u32 %v58_v43, 5 }
  0xa3   :  { %v61_v47 = vsub.s32 32, %v60_v45  ;;  %v72_v49 = vshll.u32 %v698_v48, %v60_v45  ;;  %v75_v51 = vshll.u32 %v699_v50, %v60_v45  ;;  %v63_v57 = vshll.u32 %v701_v56, %v60_v45 }
  0xa4   :  { %v66_v60 = vshll.u32 %v702_v58, %v60_v45  ;;  %v69_v63 = vshll.u32 %v703_v61, %v60_v45  ;;  %vm81_vm1 = vcmp.lt.s32.totalorder %v59_v46, 4  ;;  %vm78_vm2 = vcmp.lt.s32.totalorder %v59_v46, 1 }
  0xa5   :  { %v73_v53 = vshrl.u32 %v699_v50, %v61_v47  ;;  %v76_v55 = vshrl.u32 %v700_v54, %v61_v47  ;;  %v64_v59 = vshrl.u32 %v702_v58, %v61_v47  ;;  %v67_v62 = vshrl.u32 %v703_v61, %v61_v47 }
  0xa6   :  { %v70_v0 = vshrl.u32 %v698_v48, %v61_v47  ;;  %v62_v4 = vshrl.u32 %v701_v56, %v61_v47  ;;  %vm79_vm3 = vcmp.lt.s32.totalorder %v59_v46, 2  ;;  %vm80_vm4 = vcmp.lt.s32.totalorder %v59_v46, 3 }
  0xa7   :  { %v74_v1 = vor.u32 %v73_v53, %v72_v49  ;;  %v77_v2 = vor.u32 %v76_v55, %v75_v51  ;;  %v65_v3 = vor.u32 %v64_v59, %v63_v57  ;;  %v68_v5 = vor.u32 %v67_v62, %v66_v60 }
  0xa8   :  { %v71_v6 = vor.u32 %v70_v0, %v69_v63 }
  0xa9   :  { %v87_v7 = vsel %vm81_vm1, %v74_v1, 920167782  ;;  %v91_v8 = vsel %vm81_vm1, %v77_v2, 1326507024  ;;  %v86_v10 = vsel %vm78_vm2, %v65_v3, %v68_v5  ;;  %v82_v13 = vsel %vm78_vm2, %v62_v4, %v65_v3 }
  0xaa   :  { %v83_v9 = vsel %vm81_vm1, %v71_v6, 2102212464  ;;  %v88_v11 = vsel %vm80_vm4, %v71_v6, %v87_v7  ;;  %v90_v12 = vsel %vm78_vm2, %v68_v5, %v71_v6  ;;  %v92_v16 = vsel %vm80_vm4, %v74_v1, %v91_v8 }
  0xab   :  { %v84_v14 = vsel %vm80_vm4, %v68_v5, %v83_v9  ;;  %v89_v15 = vsel %vm79_vm3, %v86_v10, %v88_v11  ;;  %v93_v17 = vsel %vm79_vm3, %v90_v12, %v92_v16  ;;  %v289_v8 = vlaneseq  ;;  %v287_v11 = vld [vmem:[%s787_s3] sm:$0x3]  ;;  %s704_s3 = smov [#allocation5]  }
  0xac   :  { %v754_v18 = vmul.u32.u64.low %v94_v52, %v89_v15  ;;  %v755_v19 = vmul.u32.u64.high %v94_v52, %v89_v15, %v754_v18  ;;  %v757_v20 = vmul.u32.u64.low %v94_v52, %v93_v17  ;;  %v758_v21 = vmul.u32.u64.high %v94_v52, %v93_v17, %v757_v20  ;;  %s520_s6 = sshll.u32 %s704_s3, 4  ;;  %s521_s6 = int_to_ptr.vmem [resolvable:$true] %s520_s6 }
  0xad   :  { %v85_v22 = vsel %vm79_vm3, %v82_v13, %v84_v14  ;;  %v290_v9 = vshrl.u32 %v289_v8, 7  ;;  %s668_s7 = scalar_lea.vmem %s521_s6, 256  ;;  %p673_p9 = scmp.lt.s32.totalorder %s521_s6, %s521_s6 }
  0xae   :  { %v104_v23 = vadd.s32 1, %v755_v19  ;;  %v101_v24 = vmul.u32 %v94_v52, %v85_v22  ;;  %vm103_vm5 = vc.u32 %v758_v21, %v754_v18  ;;  %v102_v37 = vadd.s32 %v754_v18, %v758_v21  ;;  %p669_p8 = scmp.ne.s32.totalorder %s521_s6, %s668_s7  ;;  %p674_p10 = scmp.lt.s32.totalorder %s668_s7, %s668_s7 }
  0xaf   :  { %v291_v10 = vsub.s32 0, %v290_v9  ;;  %v295_v12 = vsub.s32 1, %v290_v9 }
  0xb0   :  { %v105_v25 = vsel %vm103_vm5, %v104_v23, %v755_v19  ;;  %p675_p11 = por %p674_p10, %p673_p9 }
  0xb1   :  { %v106_v26 = vadd.s32 %v105_v25, %v101_v24  ;;  %v292_v13 = vrot.slane %v287_v11, %v291_v10  ;;  %v296_v14 = vrot.slane %v287_v11, %v295_v12 }
  0xb2   :  { %p676_p12 = pnand %p675_p11, %p669_p8 }
  0xb3   :  { %v107_v27 = vadd.s32 536870912, %v106_v26 }
  0xb5   :  { %v108_v28 = vshrl.u32 %v107_v27, 30 }
  0xb7   :  { %v109_v29 = vshll.u32 %v108_v28, 30  ;;  %v132_v50 = vsub.s32 4, %v108_v28 }
  0xb9   :  { %v110_v30 = vsub.s32 %v106_v26, %v109_v29  ;;  %v133_v53 = vsel %vm48_vm7, %v132_v50, %v108_v28 }
  0xba   :  { %v135_v55 = vsel %vm47_vm8, 0, %v133_v53 }
  0xbb   :  { %v112_v31 = vsub.s32 0, %v110_v30  ;;  %v139_v56 = vadd.s32 3, %v135_v55  ;;  %v243_v58 = vand.u32 3, %v135_v55 }
  0xbd   :  { %v531_v32 = vmin.u32 %v112_v31, %v110_v30  ;;  %v140_v57 = vand.u32 3, %v139_v56  ;;  %vm248_vm10 = vcmp.eq.s32.totalorder %v243_v58, 2  ;;  %vm245_vm12 = vcmp.eq.s32.totalorder %v243_v58, 0 }
  0xbe   :  { %vm244_vm14 = vcmp.lt.s32.totalorder %v243_v58, 2 }
  0xbf   :  { %v114_v33 = vclz %v531_v32  ;;  %vm145_vm9 = vcmp.eq.s32.totalorder %v140_v57, 2  ;;  %vm142_vm11 = vcmp.eq.s32.totalorder %v140_v57, 0  ;;  %vm141_vm13 = vcmp.lt.s32.totalorder %v140_v57, 2 }
  0xc1   :  { %v532_v34 = vadd.s32 4294967294, %v114_v33 }
  0xc3   :  { %vm533_vm6 = vcmp.lt.s32.totalorder %v532_v34, 0 }
  0xc4   :  { %v117_v35 = vsel %vm533_vm6, 0, %v532_v34 }
  0xc5   :  { %v118_v39 = vsub.s32 32, %v117_v35  ;;  %v122_v40 = vsub.s32 4294967266, %v117_v35  ;;  %v119_v41 = vshll.u32 %v110_v30, %v117_v35 }
  0xc7   :  { %v120_v42 = vshrl.u32 %v102_v37, %v118_v39  ;;  %v123_v43 = vadd.s32 127, %v122_v40 }
  0xc9   :  { %v121_v44 = vor.u32 %v120_v42, %v119_v41  ;;  %v124_v45 = vshll.u32 %v123_v43, 23 }
  0xcb   :  { %v125_v46 = vor.u32 4788187, %v124_v45  ;;  %v128_v48 = vcvt.s32.f32 %v121_v44 }
  0xcd   :  { %v126_v47 = vand.u32 2147483647, %v125_v46 }
  0xcf   :  { %v129_v49 = vmul.f32 %v128_v48, %v126_v47 }
  0xd1   :  { %v130_v51 = vxor.u32 2147483648, %v129_v49 }
  0xd3   :  { %v131_v52 = vsel %vm48_vm7, %v130_v51, %v129_v49 }
  0xd4   :  { %v134_v54 = vsel %vm47_vm8, %v748_v36, %v131_v52 }
  0xd5   :  { %634 = vcosq.f32 %v134_v54 }
  0xd6   :  { %636 = vsinq.f32 %v134_v54 }
  0xdf   :  { %v635_v59 = vpop.eup %634 }
  0xe0   :  { %v637_v60 = vpop.eup %636  ;;  %v146_v61 = vxor.u32 2147483648, %v635_v59 }
  0xe1   :  { %v143_v62 = vxor.u32 2147483648, %v637_v60 }
  0xe2   :  { %v147_v63 = vsel %vm145_vm9, %v146_v61, %v637_v60  ;;  %v250_v38 = vsel %vm248_vm10, %v146_v61, %v637_v60 }
  0xe3   :  { %v144_v0 = vsel %vm142_vm11, %v635_v59, %v143_v62  ;;  %v247_v1 = vsel %vm245_vm12, %v635_v59, %v143_v62 }
  0xe4   :  { %v148_v2 = vsel %vm141_vm13, %v144_v0, %v147_v63  ;;  %v251_v3 = vsel %vm244_vm14, %v247_v1, %v250_v38 }
  0xe5   :  { %v149_v4 = vsel %vm138_vm15, nan, %v148_v2  ;;  %v252_v5 = vsel %vm138_vm15, nan, %v251_v3 }
  0xe6   :  { %v253_v6 = vpack.c.bf16 %v149_v4, %v149_v4  ;;  %v254_v7 = vpack.c.bf16 %v252_v5, %v252_v5 }
  0xe8   :  { %491 = vmatprep.mubr.bf16.mxu0 %v254_v7 }
  0xe9   :  { %492 = vmatmul.mubr.bf16.vlgmr.msra.gmra.mrb[0].mxu0 %v253_v6 }
 0x1bc   :  { %v493_v15 = vpop.f32.mrb[0].mxu0 }
 0x1bd   :  { %v494_v36 = vadd.f32 %v493_v15, %v292_v13  ;;  %v495_v16 = vpop.f32.mrb[1].mxu0 }
 0x1be   :  { %v496_v17 = vadd.f32 %v495_v16, %v296_v14  ;;  %v497_v18 = vpop.f32.mrb[2].mxu0 }
 0x1bf   :  { %v500_v19 = vsub.f32 0.0, %v494_v36  ;;  %v498_v20 = vpop.f32.mrb[3].mxu0 }
 0x1c0   :  { %v501_v21 = vsub.f32 0.0, %v496_v17 }
 0x1c1   :  { %v502_v22 = vmul.f32 1.442695, %v500_v19 }
 0x1c2   :  { %v504_v23 = vmul.f32 1.442695, %v501_v21 }
 0x1c3   :  { %638 = vpow2.f32 %v502_v22 }
 0x1c4   :  { %640 = vpow2.f32 %v504_v23 }
 0x1cd   :  { %v639_v24 = vpop.eup %638 }
 0x1ce   :  { %v641_v25 = vpop.eup %640  ;;  %v506_v26 = vadd.f32 1.0, %v639_v24 }
 0x1cf   :  { %v507_v27 = vadd.f32 1.0, %v641_v25 }
 0x1d0   :  { %642 = vrcp.f32 %v506_v26 }
 0x1d1   :  { %644 = vrcp.f32 %v507_v27 }
 0x1da   :  { %v643_v28 = vpop.eup %642 }
 0x1db   :  { %v645_v29 = vpop.eup %644  ;;  %v510_v30 = vmul.f32 %v643_v28, %v494_v36 }
 0x1dc   :  { %v511_v31 = vmul.f32 %v645_v29, %v496_v17 }
 0x1dd   :  { %512 = vst [vmem:[#allocation5] sm:$0xff] %v510_v30 }
 0x1de   :  { %513 = vst [vmem:[#allocation5 + $0x8] sm:$0xff] %v511_v31 }
 0x1df   :  { %679 = shalt.err (!%p676_p12)
}
 0x1e0   :  { %s680_s10 = scalar_lea.hbm %s788_s4, 256 }
 0x1e1   :  { %p681_p13 = scmp.ne.s32.totalorder %s788_s4, %s680_s10  ;;  %p684_p0 = scmp.lt.u32.totalorder %s680_s10, %s788_s4 }
 0x1e3   :  { %p686_p1 = pnand %p684_p0, %p681_p13 }
 0x1e5   :  { %689 = shalt.err (!%p686_p1)
}
 0x1e6   :  { %523 = dma.vmem_to_hbm [thread:$0]  %s521_s6, 256, %s788_s4, [#allocation4]  }
 0x1e7   :  { %692 = dma.done.wait [#allocation4], 256  }
 0x1e8   :  { %693 = vsyncadd [#allocation4], 4294967040 }
 0x1e9   :  { %527 = vsyncpa [#allocation3], 1 }
 0x1ea   :  { %528 = vsyncpa [#allocation4], 1 }

</bundles_post_ra>
